<compile_context>
chip_gen: v6e
topology: v6e:2x2x1
jax: 0.10.0
libtpu: 0.0.40
codegen_flags: <defaults>
</compile_context>

<pallas_src>
import jax
import jax.numpy as jnp
from jax.experimental import pallas as pl
from jax.experimental.pallas import tpu as pltpu

IN_DIM = 300
HID_DIM = 256
OUT_DIM = 300

LANE = 128
IN_PAD = 384   # round_up(300, 128)
OUT_PAD = 384  # round_up(300, 128)


def _round_up(n, m):
    return ((n + m - 1) // m) * m


def generator_kernel(x_ref, w1_ref, b1_ref, w2_ref, b2_ref, w3_ref, b3_ref, o_ref):
    # Layer 1: Conv1d(300, 256, k=1) on a length-1 seq == Linear(300, 256), then ReLU.
    h1 = jnp.dot(x_ref[...], w1_ref[...], preferred_element_type=jnp.float32)
    h1 = jnp.maximum(h1 + b1_ref[...], 0.0)
    # Layer 2: Linear(256, 256) + ReLU.
    h2 = jnp.dot(h1, w2_ref[...], preferred_element_type=jnp.float32)
    h2 = jnp.maximum(h2 + b2_ref[...], 0.0)
    # Layer 3: Linear(256, 300) + Tanh (output padded to 384 lanes, zeros past 300).
    h3 = jnp.dot(h2, w3_ref[...], preferred_element_type=jnp.float32)
    o_ref[...] = jnp.tanh(h3 + b3_ref[...]).astype(o_ref.dtype)


def generator_forward(x, params, block_b=512):
    """x: (B, 300) float32 -> (B, 300) float32."""
    w1, b1, w2, b2, w3, b3 = params
    B = x.shape[0]

    # Batch tile: multiple of 8 (sublane); caps at block_b (a multiple of 128)
    # so large batches fill MXU rows and amortize per-grid-step overhead.
    TB = min(block_b, _round_up(B, 8))
    B_pad = _round_up(B, TB)
    grid = (B_pad // TB,)

    f32 = jnp.float32
    # Zero-pad ragged dims: zeros contribute nothing to the matmuls, and padded
    # output columns/rows are sliced away below.
    x_p = jnp.pad(x.astype(f32), ((0, B_pad - B), (0, IN_PAD - IN_DIM)))
    w1_p = jnp.pad(w1.astype(f32), ((0, IN_PAD - IN_DIM), (0, 0)))
    b1_p = b1.astype(f32).reshape(1, HID_DIM)
    w2_p = w2.astype(f32)
    b2_p = b2.astype(f32).reshape(1, HID_DIM)
    w3_p = jnp.pad(w3.astype(f32), ((0, 0), (0, OUT_PAD - OUT_DIM)))
    b3_p = jnp.pad(b3.astype(f32).reshape(1, OUT_DIM), ((0, 0), (0, OUT_PAD - OUT_DIM)))

    # Weights/biases: constant block index -> resident in VMEM across the batch
    # grid (DMA'd once). x/out are tiled along the batch axis only.
    const2d = lambda shape: pl.BlockSpec(shape, lambda i: (0, 0))

    flops = 2 * B_pad * (IN_PAD * HID_DIM + HID_DIM * HID_DIM + HID_DIM * OUT_PAD)
    transcendentals = B_pad * OUT_PAD
    bytes_accessed = 4 * (
        B_pad * IN_PAD + B_pad * OUT_PAD
        + IN_PAD * HID_DIM + HID_DIM * HID_DIM + HID_DIM * OUT_PAD
        + 2 * HID_DIM + OUT_PAD
    )

    out_padded = pl.pallas_call(
        generator_kernel,
        out_shape=jax.ShapeDtypeStruct((B_pad, OUT_PAD), jnp.float32),
        grid=grid,
        in_specs=[
            pl.BlockSpec((TB, IN_PAD), lambda i: (i, 0)),
            const2d((IN_PAD, HID_DIM)),
            const2d((1, HID_DIM)),
            const2d((HID_DIM, HID_DIM)),
            const2d((1, HID_DIM)),
            const2d((HID_DIM, OUT_PAD)),
            const2d((1, OUT_PAD)),
        ],
        out_specs=pl.BlockSpec((TB, OUT_PAD), lambda i: (i, 0)),
        compiler_params=pltpu.CompilerParams(
            dimension_semantics=("parallel",),
        ),
        cost_estimate=pl.CostEstimate(
            flops=flops,
            transcendentals=transcendentals,
            bytes_accessed=bytes_accessed,
        ),
    )(x_p, w1_p, b1_p, w2_p, b2_p, w3_p, b3_p)

    return out_padded[:B, :OUT_DIM]


def init_params(key):
    """Deterministic PyTorch-style uniform(-1/sqrt(fan_in), 1/sqrt(fan_in)) init."""
    ks = jax.random.split(key, 6)

    def uni(k, shape, fan_in):
        bound = 1.0 / jnp.sqrt(float(fan_in))
        return jax.random.uniform(k, shape, jnp.float32, -bound, bound)

    # Conv1d(300, 256, k=1): weight (256, 300, 1) -> stored transposed (300, 256).
    w1 = uni(ks[0], (IN_DIM, HID_DIM), IN_DIM)
    b1 = uni(ks[1], (1, HID_DIM), IN_DIM)
    # Linear(256, 256): stored as (in, out).
    w2 = uni(ks[2], (HID_DIM, HID_DIM), HID_DIM)
    b2 = uni(ks[3], (1, HID_DIM), HID_DIM)
    # Linear(256, 300)
    w3 = uni(ks[4], (HID_DIM, OUT_DIM), HID_DIM)
    b3 = uni(ks[5], (1, OUT_DIM), HID_DIM)
    return (w1, b1, w2, b2, w3, b3)


def reference_forward(x, params):
    w1, b1, w2, b2, w3, b3 = params
    h1 = jnp.maximum(x @ w1 + b1, 0.0)
    h2 = jnp.maximum(h1 @ w2 + b2, 0.0)
    return jnp.tanh(h2 @ w3 + b3)


if __name__ == "__main__":
    key = jax.random.PRNGKey(0)
    k_x, k_p = jax.random.split(key)

    B = 8
    x = jax.random.normal(k_x, (B, IN_DIM), dtype=jnp.float32)
    params = init_params(k_p)

    fwd = jax.jit(lambda xx, pp: generator_forward(xx, pp))
    out = jax.block_until_ready(fwd(x, params))

    ref = reference_forward(x, params)
    assert out.shape == (B, OUT_DIM)
    assert jnp.allclose(out, ref, atol=1e-5, rtol=1e-5)

    print("KERNEL_OK")
</pallas_src>

<mosaic_0001>
module attributes {stable_mosaic.version = 11 : i64} {
  func.func @generator_kernel(%arg0: i32, %arg1: memref<8x384xf32, #tpu.memory_space<vmem>>, %arg2: memref<384x256xf32, #tpu.memory_space<vmem>>, %arg3: memref<1x256xf32, #tpu.memory_space<vmem>>, %arg4: memref<256x256xf32, #tpu.memory_space<vmem>>, %arg5: memref<1x256xf32, #tpu.memory_space<vmem>>, %arg6: memref<256x384xf32, #tpu.memory_space<vmem>>, %arg7: memref<1x384xf32, #tpu.memory_space<vmem>>, %arg8: memref<8x384xf32, #tpu.memory_space<vmem>>) attributes {dimension_semantics = [#tpu.dimension_semantics<parallel>], iteration_bounds = array<i64: 1>, scalar_prefetch = 0 : i64, scratch_operands = 0 : i64, tpu.core_type = #tpu.core_type<tc>, window_params = [{transform_indices = @transform_0, window_bounds = array<i64: 8, 384>}, {pipeline_mode = #tpu.pipeline_mode<synchronous>, transform_indices = @transform_1, window_bounds = array<i64: 384, 256>}, {pipeline_mode = #tpu.pipeline_mode<synchronous>, transform_indices = @transform_2, window_bounds = array<i64: 1, 256>}, {pipeline_mode = #tpu.pipeline_mode<synchronous>, transform_indices = @transform_3, window_bounds = array<i64: 256, 256>}, {pipeline_mode = #tpu.pipeline_mode<synchronous>, transform_indices = @transform_4, window_bounds = array<i64: 1, 256>}, {pipeline_mode = #tpu.pipeline_mode<synchronous>, transform_indices = @transform_5, window_bounds = array<i64: 256, 384>}, {pipeline_mode = #tpu.pipeline_mode<synchronous>, transform_indices = @transform_6, window_bounds = array<i64: 1, 384>}, {transform_indices = @transform_7, window_bounds = array<i64: 8, 384>}]} {
    %c0 = arith.constant 0 : index
    %c0_0 = arith.constant 0 : index
    %0 = vector.load %arg1[%c0, %c0_0] : memref<8x384xf32, #tpu.memory_space<vmem>>, vector<8x384xf32>
    %c0_1 = arith.constant 0 : index
    %c0_2 = arith.constant 0 : index
    %1 = vector.load %arg2[%c0_1, %c0_2] : memref<384x256xf32, #tpu.memory_space<vmem>>, vector<384x256xf32>
    %cst = arith.constant dense<0.000000e+00> : vector<8x256xf32>
    %2 = tpu.matmul %0, %1, %cst {dimension_numbers = #tpu.dot_dimension_numbers<[1], [0], [0], [1], [0, 0, 1, 1], [], []>} : vector<8x384xf32>, vector<384x256xf32>, vector<8x256xf32> -> vector<8x256xf32>
    %c0_3 = arith.constant 0 : index
    %c0_4 = arith.constant 0 : index
    %3 = vector.load %arg3[%c0_3, %c0_4] : memref<1x256xf32, #tpu.memory_space<vmem>>, vector<1x256xf32>
    %4 = vector.broadcast %3 : vector<1x256xf32> to vector<8x256xf32>
    %5 = arith.addf %2, %4 : vector<8x256xf32>
    %cst_5 = arith.constant 0.000000e+00 : f32
    %6 = vector.broadcast %cst_5 : f32 to vector<8x256xf32>
    %7 = arith.maximumf %5, %6 : vector<8x256xf32>
    %c0_6 = arith.constant 0 : index
    %c0_7 = arith.constant 0 : index
    %8 = vector.load %arg4[%c0_6, %c0_7] : memref<256x256xf32, #tpu.memory_space<vmem>>, vector<256x256xf32>
    %cst_8 = arith.constant dense<0.000000e+00> : vector<8x256xf32>
    %9 = tpu.matmul %7, %8, %cst_8 {dimension_numbers = #tpu.dot_dimension_numbers<[1], [0], [0], [1], [0, 0, 1, 1], [], []>} : vector<8x256xf32>, vector<256x256xf32>, vector<8x256xf32> -> vector<8x256xf32>
    %c0_9 = arith.constant 0 : index
    %c0_10 = arith.constant 0 : index
    %10 = vector.load %arg5[%c0_9, %c0_10] : memref<1x256xf32, #tpu.memory_space<vmem>>, vector<1x256xf32>
    %11 = vector.broadcast %10 : vector<1x256xf32> to vector<8x256xf32>
    %12 = arith.addf %9, %11 : vector<8x256xf32>
    %cst_11 = arith.constant 0.000000e+00 : f32
    %13 = vector.broadcast %cst_11 : f32 to vector<8x256xf32>
    %14 = arith.maximumf %12, %13 : vector<8x256xf32>
    %c0_12 = arith.constant 0 : index
    %c0_13 = arith.constant 0 : index
    %15 = vector.load %arg6[%c0_12, %c0_13] : memref<256x384xf32, #tpu.memory_space<vmem>>, vector<256x384xf32>
    %cst_14 = arith.constant dense<0.000000e+00> : vector<8x384xf32>
    %16 = tpu.matmul %14, %15, %cst_14 {dimension_numbers = #tpu.dot_dimension_numbers<[1], [0], [0], [1], [0, 0, 1, 1], [], []>} : vector<8x256xf32>, vector<256x384xf32>, vector<8x384xf32> -> vector<8x384xf32>
    %c0_15 = arith.constant 0 : index
    %c0_16 = arith.constant 0 : index
    %17 = vector.load %arg7[%c0_15, %c0_16] : memref<1x384xf32, #tpu.memory_space<vmem>>, vector<1x384xf32>
    %18 = vector.broadcast %17 : vector<1x384xf32> to vector<8x384xf32>
    %19 = arith.addf %16, %18 : vector<8x384xf32>
    %20 = math.tanh %19 : vector<8x384xf32>
    %c0_17 = arith.constant 0 : index
    %c0_18 = arith.constant 0 : index
    %21 = vector.load %arg8[%c0_17, %c0_18] : memref<8x384xf32, #tpu.memory_space<vmem>>, vector<8x384xf32>
    tpu.vector_store %arg8[%c0_17, %c0_18], %20 {strides = array<i32>} : memref<8x384xf32, #tpu.memory_space<vmem>>, vector<8x384xf32>,
    return
  }
  func.func @transform_0(%arg0: i32) -> (i32, i32) {
    %c0_i32 = arith.constant 0 : i32
    %c0_i32_0 = arith.constant 0 : i32
    return %arg0, %c0_i32 : i32, i32
  }
  func.func @transform_1(%arg0: i32) -> (i32, i32) {
    %c0_i32 = arith.constant 0 : i32
    %c0_i32_0 = arith.constant 0 : i32
    %c0_i32_1 = arith.constant 0 : i32
    return %c0_i32, %c0_i32_0 : i32, i32
  }
  func.func @transform_2(%arg0: i32) -> (i32, i32) {
    %c0_i32 = arith.constant 0 : i32
    %c0_i32_0 = arith.constant 0 : i32
    %c0_i32_1 = arith.constant 0 : i32
    return %c0_i32, %c0_i32_0 : i32, i32
  }
  func.func @transform_3(%arg0: i32) -> (i32, i32) {
    %c0_i32 = arith.constant 0 : i32
    %c0_i32_0 = arith.constant 0 : i32
    %c0_i32_1 = arith.constant 0 : i32
    return %c0_i32, %c0_i32_0 : i32, i32
  }
  func.func @transform_4(%arg0: i32) -> (i32, i32) {
    %c0_i32 = arith.constant 0 : i32
    %c0_i32_0 = arith.constant 0 : i32
    %c0_i32_1 = arith.constant 0 : i32
    return %c0_i32, %c0_i32_0 : i32, i32
  }
  func.func @transform_5(%arg0: i32) -> (i32, i32) {
    %c0_i32 = arith.constant 0 : i32
    %c0_i32_0 = arith.constant 0 : i32
    %c0_i32_1 = arith.constant 0 : i32
    return %c0_i32, %c0_i32_0 : i32, i32
  }
  func.func @transform_6(%arg0: i32) -> (i32, i32) {
    %c0_i32 = arith.constant 0 : i32
    %c0_i32_0 = arith.constant 0 : i32
    %c0_i32_1 = arith.constant 0 : i32
    return %c0_i32, %c0_i32_0 : i32, i32
  }
  func.func @transform_7(%arg0: i32) -> (i32, i32) {
    %c0_i32 = arith.constant 0 : i32
    %c0_i32_0 = arith.constant 0 : i32
    return %arg0, %c0_i32 : i32, i32
  }
}

</mosaic_0001>

<bundles_post_ra>
// kernel: _lambda_.1
= control target key start
LH: loop header
LB: loop body
LE: loop exit
PB: predicated region body
PF: predicated region fallthrough
CT: control target
= control target key end

     0   :  { %v770_v4 = vmov 0.0   ;;  %s1616_s0 = inlined_call_operand.vmem [shape: f32[8,384], index: 0, kind: input, shape index: {}]   ;;  %s1617_s1 = inlined_call_operand.vmem [shape: f32[384,256], index: 1, kind: input, shape index: {}]   ;;  %s1618_s2 = inlined_call_operand.vmem [shape: f32[1,256], index: 2, kind: input, shape index: {}]   ;;  %s1619_s3 = inlined_call_operand.vmem [shape: f32[256,256], index: 3, kind: input, shape index: {}]   ;;  %s1620_s4 = inlined_call_operand.vmem [shape: f32[1,256], index: 4, kind: input, shape index: {}]   ;;  %s1621_s5 = inlined_call_operand.vmem [shape: f32[256,384], index: 5, kind: input, shape index: {}]   ;;  %s1622_s6 = inlined_call_operand.vmem [shape: f32[1,384], index: 6, kind: input, shape index: {}]   ;;  %s1623_s7 = inlined_call_operand.hbm [shape: f32[8,384], index: 7, kind: output, shape index: {}]  }
   0x1   :  { %v61_v0 = vld [vmem:[%s1617_s1 + $0xf8] sm:$0xff]  ;;  %v60_v1 = vld [vmem:[%s1617_s1 + $0xf0] sm:$0xff]  ;;  %v59_v2 = vld [vmem:[%s1617_s1 + $0xe8] sm:$0xff]  ;;  %273 = vmatprep.mubr.f32.mxu1 %v770_v4 }
   0x2   :  { %138 = vmatprep.subr.mxu0 %v61_v0  ;;  %v58_v3 = vld [vmem:[%s1617_s1 + $0xe0] sm:$0xff]  ;;  %v57_v5 = vld [vmem:[%s1617_s1 + $0xd8] sm:$0xff]  ;;  %v56_v6 = vld [vmem:[%s1617_s1 + $0xd0] sm:$0xff] }
   0x3   :  { %139 = vmatpush1.msra.mxu0 %v60_v1  ;;  %v55_v7 = vld [vmem:[%s1617_s1 + $0xc8] sm:$0xff]  ;;  %v54_v8 = vld [vmem:[%s1617_s1 + $0xc0] sm:$0xff]  ;;  %v53_v9 = vld [vmem:[%s1617_s1 + $0xb8] sm:$0xff] }
   0x4   :  { %140 = vmatprep.subr.mxu0 %v59_v2  ;;  %v52_v10 = vld [vmem:[%s1617_s1 + $0xb0] sm:$0xff]  ;;  %v51_v11 = vld [vmem:[%s1617_s1 + $0xa8] sm:$0xff]  ;;  %v50_v12 = vld [vmem:[%s1617_s1 + $0xa0] sm:$0xff] }
   0x5   :  { %141 = vmatpush1.msra.mxu0 %v58_v3  ;;  %v49_v13 = vld [vmem:[%s1617_s1 + $0x98] sm:$0xff]  ;;  %v48_v14 = vld [vmem:[%s1617_s1 + $0x90] sm:$0xff]  ;;  %v47_v17 = vld [vmem:[%s1617_s1 + $0x88] sm:$0xff] }
   0x6   :  { %142 = vmatprep.subr.mxu0 %v57_v5  ;;  %v125_v15 = vld [vmem:[%s1617_s1 + $0x2f8] sm:$0xff]  ;;  %v124_v16 = vld [vmem:[%s1617_s1 + $0x2f0] sm:$0xff]  ;;  %v123_v18 = vld [vmem:[%s1617_s1 + $0x2e8] sm:$0xff] }
   0x7   :  { %143 = vmatpush1.msra.mxu0 %v56_v6  ;;  %209 = vmatprep.subr.mxu1 %v125_v15  ;;  %v46_v19 = vld [vmem:[%s1617_s1 + $0x80] sm:$0xff]  ;;  %v121_v21 = vld [vmem:[%s1617_s1 + $0x2d8] sm:$0xff]  ;;  %v120_v23 = vld [vmem:[%s1617_s1 + $0x2d0] sm:$0xff] }
   0x8   :  { %144 = vmatprep.subr.mxu0 %v55_v7  ;;  %210 = vmatpush1.msra.mxu1 %v124_v16  ;;  %v122_v20 = vld [vmem:[%s1617_s1 + $0x2e0] sm:$0xff]  ;;  %v45_v22 = vld [vmem:[%s1617_s1 + $0x78] sm:$0xff]  ;;  %v44_v24 = vld [vmem:[%s1617_s1 + $0x70] sm:$0xff] }
   0x9   :  { %145 = vmatpush1.msra.mxu0 %v54_v8  ;;  %211 = vmatprep.subr.mxu1 %v123_v18  ;;  %v119_v25 = vld [vmem:[%s1617_s1 + $0x2c8] sm:$0xff]  ;;  %v118_v27 = vld [vmem:[%s1617_s1 + $0x2c0] sm:$0xff]  ;;  %v117_v29 = vld [vmem:[%s1617_s1 + $0x2b8] sm:$0xff] }
   0xa   :  { %146 = vmatprep.subr.mxu0 %v53_v9  ;;  %212 = vmatpush1.msra.mxu1 %v122_v20  ;;  %v43_v26 = vld [vmem:[%s1617_s1 + $0x68] sm:$0xff]  ;;  %v42_v28 = vld [vmem:[%s1617_s1 + $0x60] sm:$0xff]  ;;  %v41_v30 = vld [vmem:[%s1617_s1 + $0x58] sm:$0xff] }
   0xb   :  { %147 = vmatpush1.msra.mxu0 %v52_v10  ;;  %213 = vmatprep.subr.mxu1 %v121_v21  ;;  %v116_v31 = vld [vmem:[%s1617_s1 + $0x2b0] sm:$0xff]  ;;  %v115_v33 = vld [vmem:[%s1617_s1 + $0x2a8] sm:$0xff]  ;;  %v114_v35 = vld [vmem:[%s1617_s1 + $0x2a0] sm:$0xff] }
   0xc   :  { %148 = vmatprep.subr.mxu0 %v51_v11  ;;  %214 = vmatpush1.msra.mxu1 %v120_v23  ;;  %v40_v32 = vld [vmem:[%s1617_s1 + $0x50] sm:$0xff]  ;;  %v39_v34 = vld [vmem:[%s1617_s1 + $0x48] sm:$0xff]  ;;  %v38_v36 = vld [vmem:[%s1617_s1 + $0x40] sm:$0xff] }
   0xd   :  { %149 = vmatpush1.msra.mxu0 %v50_v12  ;;  %215 = vmatprep.subr.mxu1 %v119_v25  ;;  %v113_v37 = vld [vmem:[%s1617_s1 + $0x298] sm:$0xff]  ;;  %v112_v39 = vld [vmem:[%s1617_s1 + $0x290] sm:$0xff]  ;;  %v111_v41 = vld [vmem:[%s1617_s1 + $0x288] sm:$0xff] }
   0xe   :  { %150 = vmatprep.subr.mxu0 %v49_v13  ;;  %216 = vmatpush1.msra.mxu1 %v118_v27  ;;  %v37_v38 = vld [vmem:[%s1617_s1 + $0x38] sm:$0xff]  ;;  %v36_v40 = vld [vmem:[%s1617_s1 + $0x30] sm:$0xff]  ;;  %v35_v42 = vld [vmem:[%s1617_s1 + $0x28] sm:$0xff] }
   0xf   :  { %151 = vmatpush1.msra.mxu0 %v48_v14  ;;  %217 = vmatprep.subr.mxu1 %v117_v29  ;;  %v110_v43 = vld [vmem:[%s1617_s1 + $0x280] sm:$0xff]  ;;  %v109_v45 = vld [vmem:[%s1617_s1 + $0x278] sm:$0xff]  ;;  %v108_v47 = vld [vmem:[%s1617_s1 + $0x270] sm:$0xff] }
  0x10   :  { %152 = vmatprep.subr.mxu0 %v47_v17  ;;  %218 = vmatpush1.msra.mxu1 %v116_v31  ;;  %v34_v44 = vld [vmem:[%s1617_s1 + $0x20] sm:$0xff]  ;;  %v33_v46 = vld [vmem:[%s1617_s1 + $0x18] sm:$0xff]  ;;  %v32_v48 = vld [vmem:[%s1617_s1 + $0x10] sm:$0xff] }
  0x11   :  { %153 = vmatpush1.msra.mxu0 %v46_v19  ;;  %219 = vmatprep.subr.mxu1 %v115_v33  ;;  %v107_v49 = vld [vmem:[%s1617_s1 + $0x268] sm:$0xff]  ;;  %v106_v51 = vld [vmem:[%s1617_s1 + $0x260] sm:$0xff]  ;;  %v105_v53 = vld [vmem:[%s1617_s1 + $0x258] sm:$0xff] }
  0x12   :  { %154 = vmatprep.subr.mxu0 %v45_v22  ;;  %220 = vmatpush1.msra.mxu1 %v114_v35  ;;  %v31_v50 = vld [vmem:[%s1617_s1 + $0x8] sm:$0xff]  ;;  %v30_v52 = vld [vmem:[%s1617_s1] sm:$0xff]  ;;  %v93_v54 = vld [vmem:[%s1617_s1 + $0x1f8] sm:$0xff] }
  0x13   :  { %155 = vmatpush1.msra.mxu0 %v44_v24  ;;  %221 = vmatprep.subr.mxu1 %v113_v37  ;;  %v104_v55 = vld [vmem:[%s1617_s1 + $0x250] sm:$0xff]  ;;  %v103_v57 = vld [vmem:[%s1617_s1 + $0x248] sm:$0xff]  ;;  %v102_v59 = vld [vmem:[%s1617_s1 + $0x240] sm:$0xff] }
  0x14   :  { %156 = vmatprep.subr.mxu0 %v43_v26  ;;  %222 = vmatpush1.msra.mxu1 %v112_v39  ;;  %v92_v56 = vld [vmem:[%s1617_s1 + $0x1f0] sm:$0xff]  ;;  %v91_v58 = vld [vmem:[%s1617_s1 + $0x1e8] sm:$0xff]  ;;  %v90_v60 = vld [vmem:[%s1617_s1 + $0x1e0] sm:$0xff] }
  0x15   :  { %157 = vmatpush1.msra.mxu0 %v42_v28  ;;  %223 = vmatprep.subr.mxu1 %v111_v41  ;;  %v101_v61 = vld [vmem:[%s1617_s1 + $0x238] sm:$0xff]  ;;  %v100_v63 = vld [vmem:[%s1617_s1 + $0x230] sm:$0xff]  ;;  %v99_v1 = vld [vmem:[%s1617_s1 + $0x228] sm:$0xff] }
  0x16   :  { %158 = vmatprep.subr.mxu0 %v41_v30  ;;  %224 = vmatpush1.msra.mxu1 %v110_v43  ;;  %v89_v62 = vld [vmem:[%s1617_s1 + $0x1d8] sm:$0xff]  ;;  %v88_v0 = vld [vmem:[%s1617_s1 + $0x1d0] sm:$0xff]  ;;  %v87_v2 = vld [vmem:[%s1617_s1 + $0x1c8] sm:$0xff] }
  0x17   :  { %159 = vmatpush1.msra.mxu0 %v40_v32  ;;  %225 = vmatprep.subr.mxu1 %v109_v45  ;;  %v98_v3 = vld [vmem:[%s1617_s1 + $0x220] sm:$0xff]  ;;  %v97_v5 = vld [vmem:[%s1617_s1 + $0x218] sm:$0xff]  ;;  %v96_v7 = vld [vmem:[%s1617_s1 + $0x210] sm:$0xff] }
  0x18   :  { %160 = vmatprep.subr.mxu0 %v39_v34  ;;  %226 = vmatpush1.msra.mxu1 %v108_v47  ;;  %v86_v4 = vld [vmem:[%s1617_s1 + $0x1c0] sm:$0xff]  ;;  %v85_v6 = vld [vmem:[%s1617_s1 + $0x1b8] sm:$0xff]  ;;  %v84_v8 = vld [vmem:[%s1617_s1 + $0x1b0] sm:$0xff] }
  0x19   :  { %161 = vmatpush1.msra.mxu0 %v38_v36  ;;  %227 = vmatprep.subr.mxu1 %v107_v49  ;;  %v95_v9 = vld [vmem:[%s1617_s1 + $0x208] sm:$0xff]  ;;  %v82_v12 = vld [vmem:[%s1617_s1 + $0x1a0] sm:$0xff]  ;;  %v81_v14 = vld [vmem:[%s1617_s1 + $0x198] sm:$0xff] }
  0x1a   :  { %162 = vmatprep.subr.mxu0 %v37_v38  ;;  %228 = vmatpush1.msra.mxu1 %v106_v51  ;;  %v83_v10 = vld [vmem:[%s1617_s1 + $0x1a8] sm:$0xff]  ;;  %v94_v13 = vld [vmem:[%s1617_s1 + $0x200] sm:$0xff]  ;;  %v29_v15 = vld [vmem:[%s1616_s0 + $0x10] sm:$0xff] }
  0x1b   :  { %163 = vmatpush1.msra.mxu0 %v36_v40  ;;  %229 = vmatprep.subr.mxu1 %v105_v53  ;;  %v28_v11 = vld [vmem:[%s1616_s0 + $0x8] sm:$0xff]  ;;  %v80_v16 = vld [vmem:[%s1617_s1 + $0x190] sm:$0xff]  ;;  %v313_v17 = vld [vmem:[%s1619_s3 + $0xf8] sm:$0xff] }
  0x1c   :  { %164 = vmatprep.subr.mxu0 %v35_v42  ;;  %230 = vmatpush1.msra.mxu1 %v104_v55  ;;  %v79_v18 = vld [vmem:[%s1617_s1 + $0x188] sm:$0xff]  ;;  %v312_v19 = vld [vmem:[%s1619_s3 + $0xf0] sm:$0xff]  ;;  %v78_v20 = vld [vmem:[%s1617_s1 + $0x180] sm:$0xff] }
  0x1d   :  { %165 = vmatpush1.msra.mxu0 %v34_v44  ;;  %231 = vmatprep.subr.mxu1 %v103_v57  ;;  %v311_v21 = vld [vmem:[%s1619_s3 + $0xe8] sm:$0xff]  ;;  %v77_v22 = vld [vmem:[%s1617_s1 + $0x178] sm:$0xff]  ;;  %v310_v23 = vld [vmem:[%s1619_s3 + $0xe0] sm:$0xff] }
  0x1e   :  { %166 = vmatprep.subr.mxu0 %v33_v46  ;;  %232 = vmatpush1.msra.mxu1 %v102_v59  ;;  %v76_v24 = vld [vmem:[%s1617_s1 + $0x170] sm:$0xff]  ;;  %v309_v25 = vld [vmem:[%s1619_s3 + $0xd8] sm:$0xff]  ;;  %v75_v26 = vld [vmem:[%s1617_s1 + $0x168] sm:$0xff] }
  0x1f   :  { %167 = vmatpush1.msra.mxu0 %v32_v48  ;;  %233 = vmatprep.subr.mxu1 %v101_v61  ;;  %v308_v27 = vld [vmem:[%s1619_s3 + $0xd0] sm:$0xff]  ;;  %v74_v28 = vld [vmem:[%s1617_s1 + $0x160] sm:$0xff]  ;;  %v307_v29 = vld [vmem:[%s1619_s3 + $0xc8] sm:$0xff] }
  0x20   :  { %168 = vmatprep.subr.mxu0 %v31_v50  ;;  %234 = vmatpush1.msra.mxu1 %v100_v63  ;;  %v73_v30 = vld [vmem:[%s1617_s1 + $0x158] sm:$0xff]  ;;  %v306_v31 = vld [vmem:[%s1619_s3 + $0xc0] sm:$0xff]  ;;  %v72_v32 = vld [vmem:[%s1617_s1 + $0x150] sm:$0xff] }
  0x21   :  { %169 = vmatpush1.msra.mxu0 %v30_v52  ;;  %235 = vmatprep.subr.mxu1 %v99_v1  ;;  %v305_v33 = vld [vmem:[%s1619_s3 + $0xb8] sm:$0xff] }
  0x22   :  { %170 = vmatprep.subr.mxu0 %v93_v54  ;;  %236 = vmatpush1.msra.mxu1 %v98_v3 }
  0x23   :  { %171 = vmatpush2.msra.mxu0 %v92_v56  ;;  %237 = vmatprep.subr.mxu1 %v97_v5 }
  0x24   :  { %172 = vmatprep.subr.mxu0 %v91_v58  ;;  %238 = vmatpush1.msra.mxu1 %v96_v7 }
  0x25   :  { %173 = vmatpush2.msra.mxu0 %v90_v60  ;;  %239 = vmatprep.subr.mxu1 %v95_v9 }
  0x26   :  { %174 = vmatprep.subr.mxu0 %v89_v62  ;;  %202 = vmatprep.mubr.f32.mxu0 %v28_v11 }
  0x27   :  { %175 = vmatpush2.msra.mxu0 %v88_v0  ;;  %240 = vmatpush1.msra.mxu1 %v94_v13 }
  0x28   :  { %176 = vmatprep.subr.mxu0 %v87_v2  ;;  %274 = vmatmul.mubr.f32.vlgmr.msra.gmra.mxu1 %v29_v15 }
  0x29   :  { %177 = vmatpush2.msra.mxu0 %v86_v4  ;;  %358 = vmatprep.subr.mxu1 %v313_v17 }
  0x2a   :  { %178 = vmatprep.subr.mxu0 %v85_v6  ;;  %359 = vmatpush1.msra.mxu1 %v312_v19 }
  0x2b   :  { %179 = vmatpush2.msra.mxu0 %v84_v8  ;;  %360 = vmatprep.subr.mxu1 %v311_v21 }
  0x2c   :  { %180 = vmatprep.subr.mxu0 %v83_v10  ;;  %361 = vmatpush1.msra.mxu1 %v310_v23 }
  0x2d   :  { %181 = vmatpush2.msra.mxu0 %v82_v12  ;;  %362 = vmatprep.subr.mxu1 %v309_v25 }
  0x2e   :  { %182 = vmatprep.subr.mxu0 %v81_v14  ;;  %363 = vmatpush1.msra.mxu1 %v308_v27 }
  0x2f   :  { %183 = vmatpush2.msra.mxu0 %v80_v16 }
  0x30   :  { %184 = vmatprep.subr.mxu0 %v79_v18 }
  0x31   :  { %185 = vmatpush2.msra.mxu0 %v78_v20 }
  0x32   :  { %186 = vmatprep.subr.mxu0 %v77_v22 }
  0x33   :  { %187 = vmatpush2.msra.mxu0 %v76_v24 }
  0x34   :  { %188 = vmatprep.subr.mxu0 %v75_v26 }
  0x35   :  { %12 = vsyncpa [#allocation3], 0  ;;  %189 = vmatpush2.msra.mxu0 %v74_v28  ;;  %v71_v34 = vld [vmem:[%s1617_s1 + $0x148] sm:$0xff]  ;;  %364 = vmatprep.subr.mxu1 %v307_v29  ;;  %v304_v35 = vld [vmem:[%s1619_s3 + $0xb0] sm:$0xff] }
  0x36   :  { %190 = vmatprep.subr.mxu0 %v73_v30  ;;  %v70_v36 = vld [vmem:[%s1617_s1 + $0x140] sm:$0xff]  ;;  %365 = vmatpush1.msra.mxu1 %v306_v31  ;;  %v303_v37 = vld [vmem:[%s1619_s3 + $0xa8] sm:$0xff]  ;;  %v69_v38 = vld [vmem:[%s1617_s1 + $0x138] sm:$0xff] }
  0x37   :  { %191 = vmatpush2.msra.mxu0 %v72_v32  ;;  %366 = vmatprep.subr.mxu1 %v305_v33  ;;  %v302_v39 = vld [vmem:[%s1619_s3 + $0xa0] sm:$0xff]  ;;  %v68_v40 = vld [vmem:[%s1617_s1 + $0x130] sm:$0xff]  ;;  %v301_v41 = vld [vmem:[%s1619_s3 + $0x98] sm:$0xff] }
  0x38   :  { %192 = vmatprep.subr.mxu0 %v71_v34  ;;  %367 = vmatpush1.msra.mxu1 %v304_v35  ;;  %v67_v42 = vld [vmem:[%s1617_s1 + $0x128] sm:$0xff]  ;;  %v300_v43 = vld [vmem:[%s1619_s3 + $0x90] sm:$0xff]  ;;  %v66_v44 = vld [vmem:[%s1617_s1 + $0x120] sm:$0xff] }
  0x39   :  { %193 = vmatpush2.msra.mxu0 %v70_v36  ;;  %368 = vmatprep.subr.mxu1 %v303_v37  ;;  %v299_v45 = vld [vmem:[%s1619_s3 + $0x88] sm:$0xff]  ;;  %v65_v46 = vld [vmem:[%s1617_s1 + $0x118] sm:$0xff]  ;;  %v298_v47 = vld [vmem:[%s1619_s3 + $0x80] sm:$0xff] }
  0x3a   :  { %194 = vmatprep.subr.mxu0 %v69_v38  ;;  %369 = vmatpush1.msra.mxu1 %v302_v39  ;;  %v64_v48 = vld [vmem:[%s1617_s1 + $0x110] sm:$0xff]  ;;  %v297_v49 = vld [vmem:[%s1619_s3 + $0x78] sm:$0xff]  ;;  %v63_v50 = vld [vmem:[%s1617_s1 + $0x108] sm:$0xff] }
  0x3b   :  { %195 = vmatpush2.msra.mxu0 %v68_v40  ;;  %370 = vmatprep.subr.mxu1 %v301_v41  ;;  %v296_v51 = vld [vmem:[%s1619_s3 + $0x70] sm:$0xff]  ;;  %v62_v52 = vld [vmem:[%s1617_s1 + $0x100] sm:$0xff]  ;;  %v295_v53 = vld [vmem:[%s1619_s3 + $0x68] sm:$0xff] }
  0x3c   :  { %196 = vmatprep.subr.mxu0 %v67_v42  ;;  %371 = vmatpush1.msra.mxu1 %v300_v43  ;;  %v27_v54 = vld [vmem:[%s1616_s0] sm:$0xff]  ;;  %v293_v56 = vld [vmem:[%s1619_s3 + $0x58] sm:$0xff]  ;;  %v292_v57 = vld [vmem:[%s1619_s3 + $0x50] sm:$0xff] }
  0x3d   :  { %197 = vmatpush2.msra.mxu0 %v66_v44  ;;  %372 = vmatprep.subr.mxu1 %v299_v45  ;;  %v294_v55 = vld [vmem:[%s1619_s3 + $0x60] sm:$0xff]  ;;  %v291_v58 = vld [vmem:[%s1619_s3 + $0x48] sm:$0xff]  ;;  %v289_v60 = vld [vmem:[%s1619_s3 + $0x38] sm:$0xff] }
  0x3e   :  { %198 = vmatprep.subr.mxu0 %v65_v46  ;;  %373 = vmatpush1.msra.mxu1 %v298_v47  ;;  %v290_v59 = vld [vmem:[%s1619_s3 + $0x40] sm:$0xff]  ;;  %v288_v61 = vld [vmem:[%s1619_s3 + $0x30] sm:$0xff]  ;;  %v287_v62 = vld [vmem:[%s1619_s3 + $0x28] sm:$0xff] }
  0x3f   :  { %199 = vmatpush2.msra.mxu0 %v64_v48  ;;  %374 = vmatprep.subr.mxu1 %v297_v49  ;;  %v286_v63 = vld [vmem:[%s1619_s3 + $0x20] sm:$0xff]  ;;  %v285_v0 = vld [vmem:[%s1619_s3 + $0x18] sm:$0xff]  ;;  %v284_v1 = vld [vmem:[%s1619_s3 + $0x10] sm:$0xff] }
  0x40   :  { %200 = vmatprep.subr.mxu0 %v63_v50  ;;  %375 = vmatpush1.msra.mxu1 %v296_v51  ;;  %v283_v2 = vld [vmem:[%s1619_s3 + $0x8] sm:$0xff]  ;;  %v282_v3 = vld [vmem:[%s1619_s3] sm:$0xff]  ;;  %v345_v4 = vld [vmem:[%s1619_s3 + $0x1f8] sm:$0xff] }
  0x41   :  { %201 = vmatpush2.msra.mxu0 %v62_v52  ;;  %376 = vmatprep.subr.mxu1 %v295_v53  ;;  %v344_v5 = vld [vmem:[%s1619_s3 + $0x1f0] sm:$0xff]  ;;  %v343_v6 = vld [vmem:[%s1619_s3 + $0x1e8] sm:$0xff]  ;;  %v342_v7 = vld [vmem:[%s1619_s3 + $0x1e0] sm:$0xff] }
  0x42   :  { %203 = vmatmul.mubr.f32.vlgmr.msra.gmra.mxu0 %v27_v54  ;;  %377 = vmatpush1.msra.mxu1 %v294_v55  ;;  %v341_v8 = vld [vmem:[%s1619_s3 + $0x1d8] sm:$0xff]  ;;  %v340_v9 = vld [vmem:[%s1619_s3 + $0x1d0] sm:$0xff]  ;;  %v339_v10 = vld [vmem:[%s1619_s3 + $0x1c8] sm:$0xff] }
  0x43   :  { %378 = vmatprep.subr.mxu1 %v293_v56  ;;  %v338_v11 = vld [vmem:[%s1619_s3 + $0x1c0] sm:$0xff]  ;;  %v337_v12 = vld [vmem:[%s1619_s3 + $0x1b8] sm:$0xff]  ;;  %v336_v13 = vld [vmem:[%s1619_s3 + $0x1b0] sm:$0xff] }
  0x44   :  { %379 = vmatpush1.msra.mxu1 %v292_v57  ;;  %v335_v14 = vld [vmem:[%s1619_s3 + $0x1a8] sm:$0xff]  ;;  %v334_v15 = vld [vmem:[%s1619_s3 + $0x1a0] sm:$0xff]  ;;  %v333_v16 = vld [vmem:[%s1619_s3 + $0x198] sm:$0xff] }
  0x45   :  { %380 = vmatprep.subr.mxu1 %v291_v58  ;;  %v332_v17 = vld [vmem:[%s1619_s3 + $0x190] sm:$0xff]  ;;  %v331_v18 = vld [vmem:[%s1619_s3 + $0x188] sm:$0xff]  ;;  %v330_v19 = vld [vmem:[%s1619_s3 + $0x180] sm:$0xff] }
  0x46   :  { %381 = vmatpush1.msra.mxu1 %v290_v59  ;;  %v329_v20 = vld [vmem:[%s1619_s3 + $0x178] sm:$0xff]  ;;  %v328_v21 = vld [vmem:[%s1619_s3 + $0x170] sm:$0xff]  ;;  %v327_v22 = vld [vmem:[%s1619_s3 + $0x168] sm:$0xff] }
  0x47   :  { %382 = vmatprep.subr.mxu1 %v289_v60  ;;  %v326_v23 = vld [vmem:[%s1619_s3 + $0x160] sm:$0xff]  ;;  %v325_v24 = vld [vmem:[%s1619_s3 + $0x158] sm:$0xff]  ;;  %v324_v25 = vld [vmem:[%s1619_s3 + $0x150] sm:$0xff] }
  0x48   :  { %383 = vmatpush1.msra.mxu1 %v288_v61  ;;  %v323_v26 = vld [vmem:[%s1619_s3 + $0x148] sm:$0xff]  ;;  %v322_v27 = vld [vmem:[%s1619_s3 + $0x140] sm:$0xff]  ;;  %v321_v28 = vld [vmem:[%s1619_s3 + $0x138] sm:$0xff] }
  0x49   :  { %384 = vmatprep.subr.mxu1 %v287_v62  ;;  %v320_v29 = vld [vmem:[%s1619_s3 + $0x130] sm:$0xff]  ;;  %v319_v30 = vld [vmem:[%s1619_s3 + $0x128] sm:$0xff]  ;;  %v318_v31 = vld [vmem:[%s1619_s3 + $0x120] sm:$0xff] }
  0x4a   :  { %385 = vmatpush1.msra.mxu1 %v286_v63  ;;  %v317_v32 = vld [vmem:[%s1619_s3 + $0x118] sm:$0xff]  ;;  %v316_v33 = vld [vmem:[%s1619_s3 + $0x110] sm:$0xff]  ;;  %v315_v34 = vld [vmem:[%s1619_s3 + $0x108] sm:$0xff] }
  0x4b   :  { %386 = vmatprep.subr.mxu1 %v285_v0  ;;  %v314_v35 = vld [vmem:[%s1619_s3 + $0x100] sm:$0xff]  ;;  %v477_v36 = vld [vmem:[%s1621_s5 + $0x170] sm:$0xff]  ;;  %v476_v37 = vld [vmem:[%s1621_s5 + $0x168] sm:$0xff] }
  0x4c   :  { %387 = vmatpush1.msra.mxu1 %v284_v1  ;;  %v474_v38 = vld [vmem:[%s1621_s5 + $0x158] sm:$0xff]  ;;  %544 = vmatprep.subr.mxu0 %v477_v36  ;;  %v473_v39 = vld [vmem:[%s1621_s5 + $0x150] sm:$0xff]  ;;  %v471_v40 = vld [vmem:[%s1621_s5 + $0x140] sm:$0xff] }
  0x4d   :  { %388 = vmatprep.subr.mxu1 %v283_v2  ;;  %545 = vmatpush1.msra.mxu0 %v476_v37  ;;  %v470_v41 = vld [vmem:[%s1621_s5 + $0x138] sm:$0xff]  ;;  %v468_v42 = vld [vmem:[%s1621_s5 + $0x128] sm:$0xff]  ;;  %v467_v43 = vld [vmem:[%s1621_s5 + $0x120] sm:$0xff] }
  0x4e   :  { %389 = vmatpush1.msra.mxu1 %v282_v3  ;;  %546 = vmatprep.subr.mxu0 %v474_v38  ;;  %v465_v44 = vld [vmem:[%s1621_s5 + $0x110] sm:$0xff]  ;;  %v464_v45 = vld [vmem:[%s1621_s5 + $0x108] sm:$0xff]  ;;  %v462_v46 = vld [vmem:[%s1621_s5 + $0xf8] sm:$0xff] }
  0x4f   :  { %390 = vmatprep.subr.mxu1 %v345_v4  ;;  %547 = vmatpush1.msra.mxu0 %v473_v39  ;;  %v461_v47 = vld [vmem:[%s1621_s5 + $0xf0] sm:$0xff]  ;;  %v459_v48 = vld [vmem:[%s1621_s5 + $0xe0] sm:$0xff]  ;;  %v458_v49 = vld [vmem:[%s1621_s5 + $0xd8] sm:$0xff] }
  0x50   :  { %391 = vmatpush2.msra.mxu1 %v344_v5  ;;  %548 = vmatprep.subr.mxu0 %v471_v40  ;;  %v526_v50 = vld [vmem:[%s1621_s5 + $0x2f8] sm:$0xff]  ;;  %v456_v51 = vld [vmem:[%s1621_s5 + $0xc8] sm:$0xff]  ;;  %v455_v52 = vld [vmem:[%s1621_s5 + $0xc0] sm:$0xff] }
  0x51   :  { %392 = vmatprep.subr.mxu1 %v343_v6  ;;  %549 = vmatpush1.msra.mxu0 %v470_v41  ;;  %v453_v53 = vld [vmem:[%s1621_s5 + $0xb0] sm:$0xff]  ;;  %v452_v54 = vld [vmem:[%s1621_s5 + $0xa8] sm:$0xff]  ;;  %v450_v55 = vld [vmem:[%s1621_s5 + $0x98] sm:$0xff] }
  0x52   :  { %393 = vmatpush2.msra.mxu1 %v342_v7  ;;  %550 = vmatprep.subr.mxu0 %v468_v42  ;;  %v449_v56 = vld [vmem:[%s1621_s5 + $0x90] sm:$0xff]  ;;  %v447_v57 = vld [vmem:[%s1621_s5 + $0x80] sm:$0xff]  ;;  %v446_v58 = vld [vmem:[%s1621_s5 + $0x78] sm:$0xff] }
  0x53   :  { %394 = vmatprep.subr.mxu1 %v341_v8  ;;  %551 = vmatpush1.msra.mxu0 %v467_v43  ;;  %v444_v59 = vld [vmem:[%s1621_s5 + $0x68] sm:$0xff]  ;;  %v443_v60 = vld [vmem:[%s1621_s5 + $0x60] sm:$0xff]  ;;  %v441_v61 = vld [vmem:[%s1621_s5 + $0x50] sm:$0xff] }
  0x54   :  { %395 = vmatpush2.msra.mxu1 %v340_v9  ;;  %552 = vmatprep.subr.mxu0 %v465_v44  ;;  %v440_v62 = vld [vmem:[%s1621_s5 + $0x48] sm:$0xff]  ;;  %v438_v63 = vld [vmem:[%s1621_s5 + $0x38] sm:$0xff]  ;;  %v437_v0 = vld [vmem:[%s1621_s5 + $0x30] sm:$0xff] }
  0x55   :  { %396 = vmatprep.subr.mxu1 %v339_v10  ;;  %553 = vmatpush1.msra.mxu0 %v464_v45  ;;  %v435_v1 = vld [vmem:[%s1621_s5 + $0x20] sm:$0xff]  ;;  %v434_v2 = vld [vmem:[%s1621_s5 + $0x18] sm:$0xff]  ;;  %v432_v3 = vld [vmem:[%s1621_s5 + $0x8] sm:$0xff] }
  0x56   :  { %397 = vmatpush2.msra.mxu1 %v338_v11  ;;  %554 = vmatprep.subr.mxu0 %v462_v46  ;;  %v431_v4 = vld [vmem:[%s1621_s5] sm:$0xff]  ;;  %v525_v5 = vld [vmem:[%s1621_s5 + $0x2f0] sm:$0xff]  ;;  %v524_v6 = vld [vmem:[%s1621_s5 + $0x2e8] sm:$0xff] }
  0x57   :  { %398 = vmatprep.subr.mxu1 %v337_v12  ;;  %555 = vmatpush1.msra.mxu0 %v461_v47  ;;  %v522_v7 = vld [vmem:[%s1621_s5 + $0x2d8] sm:$0xff]  ;;  %v521_v8 = vld [vmem:[%s1621_s5 + $0x2d0] sm:$0xff]  ;;  %v519_v9 = vld [vmem:[%s1621_s5 + $0x2c0] sm:$0xff] }
  0x58   :  { %399 = vmatpush2.msra.mxu1 %v336_v13  ;;  %556 = vmatprep.subr.mxu0 %v459_v48  ;;  %v518_v10 = vld [vmem:[%s1621_s5 + $0x2b8] sm:$0xff]  ;;  %v516_v11 = vld [vmem:[%s1621_s5 + $0x2a8] sm:$0xff]  ;;  %v515_v12 = vld [vmem:[%s1621_s5 + $0x2a0] sm:$0xff] }
  0x59   :  { %400 = vmatprep.subr.mxu1 %v335_v14  ;;  %557 = vmatpush1.msra.mxu0 %v458_v49  ;;  %v513_v13 = vld [vmem:[%s1621_s5 + $0x290] sm:$0xff]  ;;  %v512_v14 = vld [vmem:[%s1621_s5 + $0x288] sm:$0xff]  ;;  %v478_v46 = vld [vmem:[%s1621_s5 + $0x178] sm:$0xff] }
  0x5a   :  { %401 = vmatpush2.msra.mxu1 %v334_v15  ;;  %558 = vmatprep.subr.mxu0 %v456_v51  ;;  %v510_v15 = vld [vmem:[%s1621_s5 + $0x278] sm:$0xff]  ;;  %v523_v47 = vld [vmem:[%s1621_s5 + $0x2e0] sm:$0xff]  ;;  %v520_v49 = vld [vmem:[%s1621_s5 + $0x2c8] sm:$0xff] }
  0x5b   :  { %402 = vmatprep.subr.mxu1 %v333_v16  ;;  %559 = vmatpush1.msra.mxu0 %v455_v52  ;;  %v509_v16 = vld [vmem:[%s1621_s5 + $0x270] sm:$0xff]  ;;  %v475_v48 = vld [vmem:[%s1621_s5 + $0x160] sm:$0xff] }
  0x5c   :  { %403 = vmatpush2.msra.mxu1 %v332_v17  ;;  %560 = vmatprep.subr.mxu0 %v453_v53  ;;  %v507_v17 = vld [vmem:[%s1621_s5 + $0x260] sm:$0xff]  ;;  %v517_v51 = vld [vmem:[%s1621_s5 + $0x2b0] sm:$0xff]  ;;  %v514_v53 = vld [vmem:[%s1621_s5 + $0x298] sm:$0xff] }
  0x5d   :  { %404 = vmatprep.subr.mxu1 %v331_v18  ;;  %561 = vmatpush1.msra.mxu0 %v452_v54  ;;  %v506_v18 = vld [vmem:[%s1621_s5 + $0x258] sm:$0xff]  ;;  %v469_v52 = vld [vmem:[%s1621_s5 + $0x130] sm:$0xff] }
  0x5e   :  { %405 = vmatpush2.msra.mxu1 %v330_v19  ;;  %562 = vmatprep.subr.mxu0 %v450_v55  ;;  %v504_v19 = vld [vmem:[%s1621_s5 + $0x248] sm:$0xff]  ;;  %v466_v54 = vld [vmem:[%s1621_s5 + $0x118] sm:$0xff]  ;;  %v511_v55 = vld [vmem:[%s1621_s5 + $0x280] sm:$0xff] }
  0x5f   :  { %406 = vmatprep.subr.mxu1 %v329_v20  ;;  %563 = vmatpush1.msra.mxu0 %v449_v56  ;;  %v503_v20 = vld [vmem:[%s1621_s5 + $0x240] sm:$0xff] }
  0x60   :  { %407 = vmatpush2.msra.mxu1 %v328_v21  ;;  %564 = vmatprep.subr.mxu0 %v447_v57  ;;  %v501_v21 = vld [vmem:[%s1621_s5 + $0x230] sm:$0xff]  ;;  %v463_v56 = vld [vmem:[%s1621_s5 + $0x100] sm:$0xff]  ;;  %v508_v57 = vld [vmem:[%s1621_s5 + $0x268] sm:$0xff] }
  0x61   :  { %408 = vmatprep.subr.mxu1 %v327_v22  ;;  %565 = vmatpush1.msra.mxu0 %v446_v58  ;;  %v500_v22 = vld [vmem:[%s1621_s5 + $0x228] sm:$0xff] }
  0x62   :  { %409 = vmatpush2.msra.mxu1 %v326_v23  ;;  %566 = vmatprep.subr.mxu0 %v444_v59  ;;  %v498_v23 = vld [vmem:[%s1621_s5 + $0x218] sm:$0xff]  ;;  %v460_v58 = vld [vmem:[%s1621_s5 + $0xe8] sm:$0xff]  ;;  %v505_v59 = vld [vmem:[%s1621_s5 + $0x250] sm:$0xff] }
  0x63   :  { %410 = vmatprep.subr.mxu1 %v325_v24  ;;  %567 = vmatpush1.msra.mxu0 %v443_v60  ;;  %v497_v24 = vld [vmem:[%s1621_s5 + $0x210] sm:$0xff] }
  0x64   :  { %411 = vmatpush2.msra.mxu1 %v324_v25  ;;  %568 = vmatprep.subr.mxu0 %v441_v61  ;;  %v495_v25 = vld [vmem:[%s1621_s5 + $0x200] sm:$0xff]  ;;  %v457_v60 = vld [vmem:[%s1621_s5 + $0xd0] sm:$0xff]  ;;  %v502_v61 = vld [vmem:[%s1621_s5 + $0x238] sm:$0xff] }
  0x65   :  { %412 = vmatprep.subr.mxu1 %v323_v26  ;;  %569 = vmatpush1.msra.mxu0 %v440_v62  ;;  %v494_v26 = vld [vmem:[%s1621_s5 + $0x1f8] sm:$0xff] }
  0x66   :  { %413 = vmatpush2.msra.mxu1 %v322_v27  ;;  %570 = vmatprep.subr.mxu0 %v438_v63  ;;  %v492_v27 = vld [vmem:[%s1621_s5 + $0x1e8] sm:$0xff]  ;;  %v454_v62 = vld [vmem:[%s1621_s5 + $0xb8] sm:$0xff]  ;;  %v499_v63 = vld [vmem:[%s1621_s5 + $0x220] sm:$0xff] }
  0x67   :  { %414 = vmatprep.subr.mxu1 %v321_v28  ;;  %571 = vmatpush1.msra.mxu0 %v437_v0  ;;  %v491_v28 = vld [vmem:[%s1621_s5 + $0x1e0] sm:$0xff] }
  0x68   :  { %415 = vmatpush2.msra.mxu1 %v320_v29  ;;  %572 = vmatprep.subr.mxu0 %v435_v1  ;;  %v128_v29 = vlaneseq  ;;  %v451_v0 = vld [vmem:[%s1621_s5 + $0xa0] sm:$0xff]  ;;  %v496_v1 = vld [vmem:[%s1621_s5 + $0x208] sm:$0xff] }
  0x69   :  { %416 = vmatprep.subr.mxu1 %v319_v30  ;;  %573 = vmatpush1.msra.mxu0 %v434_v2  ;;  %v448_v2 = vld [vmem:[%s1621_s5 + $0x88] sm:$0xff] }
  0x6a   :  { %417 = vmatpush2.msra.mxu1 %v318_v31  ;;  %574 = vmatprep.subr.mxu0 %v432_v3  ;;  %v1472_v30 = vshrl.u32 %v128_v29, 7  ;;  %v493_v3 = vld [vmem:[%s1621_s5 + $0x1f0] sm:$0xff] }
  0x6b   :  { %418 = vmatprep.subr.mxu1 %v317_v32  ;;  %575 = vmatpush1.msra.mxu0 %v431_v4  ;;  %v126_v32 = vld [vmem:[%s1618_s2] sm:$0x3]  ;;  %v445_v4 = vld [vmem:[%s1621_s5 + $0x70] sm:$0xff] }
  0x6c   :  { %419 = vmatpush2.msra.mxu1 %v316_v33  ;;  %576 = vmatprep.subr.mxu0 %v525_v5  ;;  %v1475_v31 = vsub.s32 0, %v1472_v30  ;;  %v1481_v33 = vsub.s32 1, %v1472_v30  ;;  %v489_v5 = vld [vmem:[%s1621_s5 + $0x1d0] sm:$0xff] }
  0x6d   :  { %420 = vmatprep.subr.mxu1 %v315_v34  ;;  %577 = vmatpush2.msra.mxu0 %v524_v6  ;;  %v490_v6 = vld [vmem:[%s1621_s5 + $0x1d8] sm:$0xff] }
  0x6e   :  { %421 = vmatpush2.msra.mxu1 %v314_v35  ;;  %578 = vmatprep.subr.mxu0 %v522_v7  ;;  %v131_v34 = vrot.slane %v126_v32, %v1475_v31  ;;  %v135_v35 = vrot.slane %v126_v32, %v1481_v33  ;;  %v488_v7 = vld [vmem:[%s1621_s5 + $0x1c8] sm:$0xff]  ;;  %v527_v32 = vld [vmem:[%s1622_s6] sm:$0x7] }
  0x6f   :  { %705 = vmatprep.subr.mxu1 %v526_v50  ;;  %579 = vmatpush2.msra.mxu0 %v521_v8  ;;  %v472_v50 = vld [vmem:[%s1621_s5 + $0x148] sm:$0xff]  ;;  %v442_v8 = vld [vmem:[%s1621_s5 + $0x58] sm:$0xff] }
  0x70   :  { %580 = vmatprep.subr.mxu0 %v519_v9  ;;  %v486_v9 = vld [vmem:[%s1621_s5 + $0x1b8] sm:$0xff] }
  0x71   :  { %581 = vmatpush2.msra.mxu0 %v518_v10  ;;  %v487_v10 = vld [vmem:[%s1621_s5 + $0x1c0] sm:$0xff] }
  0x72   :  { %582 = vmatprep.subr.mxu0 %v516_v11  ;;  %v485_v11 = vld [vmem:[%s1621_s5 + $0x1b0] sm:$0xff] }
  0x73   :  { %583 = vmatpush2.msra.mxu0 %v515_v12  ;;  %v439_v12 = vld [vmem:[%s1621_s5 + $0x40] sm:$0xff] }
  0x74   :  { %584 = vmatprep.subr.mxu0 %v513_v13  ;;  %v483_v13 = vld [vmem:[%s1621_s5 + $0x1a0] sm:$0xff] }
  0x75   :  { %585 = vmatpush2.msra.mxu0 %v512_v14  ;;  %v484_v14 = vld [vmem:[%s1621_s5 + $0x1a8] sm:$0xff] }
  0x76   :  { %586 = vmatprep.subr.mxu0 %v510_v15  ;;  %v482_v15 = vld [vmem:[%s1621_s5 + $0x198] sm:$0xff] }
  0x77   :  { %587 = vmatpush2.msra.mxu0 %v509_v16  ;;  %v436_v16 = vld [vmem:[%s1621_s5 + $0x28] sm:$0xff] }
  0x78   :  { %588 = vmatprep.subr.mxu0 %v507_v17  ;;  %v480_v17 = vld [vmem:[%s1621_s5 + $0x188] sm:$0xff] }
  0x79   :  { %589 = vmatpush2.msra.mxu0 %v506_v18  ;;  %v481_v18 = vld [vmem:[%s1621_s5 + $0x190] sm:$0xff] }
  0x7a   :  { %590 = vmatprep.subr.mxu0 %v504_v19  ;;  %v479_v19 = vld [vmem:[%s1621_s5 + $0x180] sm:$0xff] }
  0x7b   :  { %591 = vmatpush2.msra.mxu0 %v503_v20  ;;  %v433_v20 = vld [vmem:[%s1621_s5 + $0x10] sm:$0xff] }
  0x7c   :  { %592 = vmatprep.subr.mxu0 %v501_v21  ;;  %v346_v21 = vld [vmem:[%s1620_s4] sm:$0x3]  ;;  %s771_s4 = smov [#allocation2]  }
  0x7d   :  { %593 = vmatpush2.msra.mxu0 %v500_v22  ;;  %v351_v22 = vrot.slane %v346_v21, %v1475_v31  ;;  %s697_s6 = sshll.u32 %s771_s4, 4  ;;  %s698_s6 = int_to_ptr.vmem [resolvable:$true] %s697_s6 }
  0x7e   :  { %594 = vmatprep.subr.mxu0 %v498_v23  ;;  %v355_v23 = vrot.slane %v346_v21, %v1481_v33  ;;  %s748_s8 = scalar_lea.vmem %s698_s6, 384  ;;  %p753_p1 = scmp.lt.s32.totalorder %s698_s6, %s698_s6 }
  0x7f   :  { %595 = vmatpush2.msra.mxu0 %v497_v24  ;;  %p749_p0 = scmp.ne.s32.totalorder %s698_s6, %s748_s8  ;;  %p754_p2 = scmp.lt.s32.totalorder %s748_s8, %s748_s8 }
  0x80   :  { %596 = vmatprep.subr.mxu0 %v495_v25 }
  0x81   :  { %597 = vmatpush2.msra.mxu0 %v494_v26  ;;  %p755_p3 = por %p754_p2, %p753_p1 }
  0x82   :  { %598 = vmatprep.subr.mxu0 %v492_v27 }
  0x83   :  { %599 = vmatpush2.msra.mxu0 %v491_v28  ;;  %p756_p4 = pnand %p755_p3, %p749_p0 }
  0x84   :  { %600 = vmatprep.subr.mxu0 %v489_v5 }
  0x85   :  { %601 = vmatpush2.msra.mxu0 %v488_v7 }
  0x86   :  { %602 = vmatprep.subr.mxu0 %v486_v9 }
  0x87   :  { %603 = vmatpush2.msra.mxu0 %v485_v11 }
  0x88   :  { %604 = vmatprep.subr.mxu0 %v483_v13 }
  0x89   :  { %605 = vmatpush2.msra.mxu0 %v482_v15 }
  0x8a   :  { %606 = vmatprep.subr.mxu0 %v480_v17 }
  0x8b   :  { %607 = vmatpush2.msra.mxu0 %v479_v19 }
  0xe8   :  { %v275_v37 = vpop.f32.mrf.mxu1 }
  0xea   :  { %v277_v42 = vpop.f32.mrf.mxu1 }
 0x102   :  { %v204_v36 = vpop.f32.mrf.mxu0 }
 0x103   :  { %v205_v38 = vadd.f32 %v204_v36, %v131_v34  ;;  %v532_v34 = vrot.slane %v527_v32, %v1475_v31  ;;  %v536_v36 = vrot.slane %v527_v32, %v1481_v33 }
 0x104   :  { %v206_v39 = vpop.f32.mrf.mxu0 }
 0x105   :  { %v207_v40 = vadd.f32 %v206_v39, %v135_v35  ;;  %v276_v41 = vadd.f32 %v275_v37, %v205_v38  ;;  %v539_v35 = vsub.s32 2, %v1472_v30 }
 0x107   :  { %v278_v43 = vadd.f32 %v277_v42, %v207_v40  ;;  %v280_v45 = vmax.f32 %v276_v41, 0.0  ;;  %v540_v40 = vrot.slane %v527_v32, %v539_v35 }
 0x109   :  { %v281_v44 = vmax.f32 %v278_v43, 0.0 }
 0x10b   :  { %422 = vmatprep.mubr.f32.mxu1 %v281_v44 }
 0x10c   :  { %423 = vmatmul.mubr.f32.vlgmr.msra.gmra.mxu1 %v280_v45 }
 0x10d   :  { %706 = vmatpush3.msra.mxu1 %v478_v46 }
 0x10e   :  { %707 = vmatprep.subr.mxu1 %v523_v47 }
 0x10f   :  { %708 = vmatpush3.msra.mxu1 %v475_v48 }
 0x110   :  { %709 = vmatprep.subr.mxu1 %v520_v49 }
 0x111   :  { %710 = vmatpush3.msra.mxu1 %v472_v50 }
 0x112   :  { %711 = vmatprep.subr.mxu1 %v517_v51 }
 0x113   :  { %712 = vmatpush3.msra.mxu1 %v469_v52 }
 0x114   :  { %713 = vmatprep.subr.mxu1 %v514_v53 }
 0x115   :  { %714 = vmatpush3.msra.mxu1 %v466_v54 }
 0x116   :  { %715 = vmatprep.subr.mxu1 %v511_v55 }
 0x117   :  { %716 = vmatpush3.msra.mxu1 %v463_v56 }
 0x118   :  { %717 = vmatprep.subr.mxu1 %v508_v57 }
 0x119   :  { %718 = vmatpush3.msra.mxu1 %v460_v58 }
 0x11a   :  { %719 = vmatprep.subr.mxu1 %v505_v59 }
 0x11b   :  { %720 = vmatpush3.msra.mxu1 %v457_v60 }
 0x11c   :  { %721 = vmatprep.subr.mxu1 %v502_v61 }
 0x11d   :  { %722 = vmatpush3.msra.mxu1 %v454_v62 }
 0x11e   :  { %723 = vmatprep.subr.mxu1 %v499_v63 }
 0x11f   :  { %724 = vmatpush3.msra.mxu1 %v451_v0 }
 0x120   :  { %725 = vmatprep.subr.mxu1 %v496_v1 }
 0x121   :  { %726 = vmatpush3.msra.mxu1 %v448_v2 }
 0x122   :  { %727 = vmatprep.subr.mxu1 %v493_v3 }
 0x123   :  { %728 = vmatpush3.msra.mxu1 %v445_v4 }
 0x124   :  { %729 = vmatprep.subr.mxu1 %v490_v6 }
 0x125   :  { %730 = vmatpush3.msra.mxu1 %v442_v8 }
 0x126   :  { %731 = vmatprep.subr.mxu1 %v487_v10 }
 0x127   :  { %732 = vmatpush3.msra.mxu1 %v439_v12 }
 0x128   :  { %733 = vmatprep.subr.mxu1 %v484_v14 }
 0x129   :  { %734 = vmatpush3.msra.mxu1 %v436_v16 }
 0x12a   :  { %735 = vmatprep.subr.mxu1 %v481_v18 }
 0x12b   :  { %736 = vmatpush3.msra.mxu1 %v433_v20 }
 0x1cc   :  { %v424_v24 = vpop.f32.mrf.mxu1 }
 0x1cd   :  { %v425_v25 = vadd.f32 %v424_v24, %v351_v22 }
 0x1ce   :  { %v426_v26 = vpop.f32.mrf.mxu1 }
 0x1cf   :  { %v427_v27 = vadd.f32 %v426_v26, %v355_v23  ;;  %v429_v29 = vmax.f32 %v425_v25, 0.0 }
 0x1d1   :  { %v430_v28 = vmax.f32 %v427_v27, 0.0 }
 0x1d3   :  { %608 = vmatprep.mubr.f32.mxu0 %v430_v28  ;;  %679 = vmatprep.mubr.f32.mxu1 %v430_v28 }
 0x1d4   :  { %609 = vmatmul.mubr.f32.vlgmr.msra.gmra.mxu0 %v429_v29  ;;  %680 = vmatmul.mubr.f32.vlgmr.msra.gmra.mxu1 %v429_v29 }
 0x294   :  { %v610_v37 = vpop.f32.mrf.mxu0  ;;  %v737_v38 = vpop.f32.mrf.mxu1 }
 0x295   :  { %v611_v39 = vadd.f32 %v610_v37, %v532_v34 }
 0x296   :  { %v612_v41 = vpop.f32.mrf.mxu0  ;;  %v738_v42 = vpop.f32.mrf.mxu1 }
 0x297   :  { %742 = vtanh.f32 %v611_v39  ;;  %v613_v43 = vadd.f32 %v612_v41, %v536_v36  ;;  %v739_v44 = vadd.f32 %v738_v42, %v737_v38 }
 0x299   :  { %744 = vtanh.f32 %v613_v43  ;;  %v682_v45 = vadd.f32 %v739_v44, %v540_v40 }
 0x29b   :  { %746 = vtanh.f32 %v682_v45 }
 0x2a4   :  { %v743_v46 = vpop.eup %742 }
 0x2a5   :  { %688 = vst [vmem:[#allocation2] sm:$0xff] %v743_v46 }
 0x2a6   :  { %v745_v31 = vpop.eup %744 }
 0x2a7   :  { %689 = vst [vmem:[#allocation2 + $0x8] sm:$0xff] %v745_v31 }
 0x2a8   :  { %v747_v30 = vpop.eup %746 }
 0x2a9   :  { %690 = vst [vmem:[#allocation2 + $0x10] sm:$0xff] %v747_v30 }
 0x2aa   :  { %759 = shalt.err (!%p756_p4)
}
 0x2ab   :  { %700 = dma.vmem_to_hbm [thread:$0]  %s698_s6, 384, %s1623_s7, [#allocation3]  }
 0x2ac   :  { %768 = dma.done.wait [#allocation3], 384  }
 0x2ad   :  { %769 = vsyncadd [#allocation3], 4294966912 }
 0x2ae   :  { %704 = vsyncpa [#allocation3], 1 }

</bundles_post_ra>
